<compile_context>
chip_gen: v6e
topology: v6e:2x2x1
jax: 0.10.0
libtpu: 0.0.40
codegen_flags: <defaults>
</compile_context>

<pallas_src>
import functools

import jax
import jax.numpy as jnp
from jax.experimental import pallas as pl
from jax.experimental.pallas import tpu as pltpu


def _round_up(x: int, m: int) -> int:
    return (x + m - 1) // m * m


def _pick_batch_tile(B: int, requested: int) -> int:
    """Sublane-aligned batch tile <= requested; split so the 'parallel' grid axis
    has >= 2 steps when the batch allows it (keeps both v7x TensorCores busy)."""
    tb = min(requested, _round_up(B, 8))
    if B > 8 and _round_up(B, tb) // tb < 2:
        tb = _round_up(max(tb // 2, 8), 8)
    return tb


def _pick_hidden_tile(Hp: int, requested: int) -> int:
    """Largest multiple of 128 that divides Hp and is <= requested."""
    tile = max(128, (min(requested, Hp) // 128) * 128)
    while Hp % tile:
        tile -= 128
    return tile


def mlp_kernel(x_ref, w1_ref, b1_ref, w2_ref, b2_ref, o_ref, acc_ref):
    h_idx = pl.program_id(1)

    @pl.when(h_idx == 0)
    def _():
        acc_ref[...] = jnp.zeros_like(acc_ref)

    # First linear, one hidden slab: x @ W1[:, slab] + b1[slab], then ReLU.
    # x arrives in its native dtype; the cast to the weight dtype runs on the VPU
    # and is hidden under the MXU work (bf16 x bf16 -> f32 accumulate).
    x = x_ref[...].astype(w1_ref.dtype)
    h = jnp.dot(x, w1_ref[...], preferred_element_type=jnp.float32)
    h = jnp.maximum(h + b1_ref[...], 0.0)

    # Second linear: accumulate this slab's contribution in f32.
    acc_ref[...] += jnp.dot(h.astype(w2_ref.dtype), w2_ref[...],
                            preferred_element_type=jnp.float32)

    @pl.when(h_idx == pl.num_programs(1) - 1)
    def _():
        o_ref[...] = (acc_ref[...] + b2_ref[...]).astype(o_ref.dtype)


def prepare_params(w1, b1, w2, b2, *, compute_dtype=jnp.bfloat16, lane_multiple=128):
    """One-time (model-load) padding + cast of the parameters.

    w1: [input_dim, hidden_dim]   b1: [hidden_dim]
    w2: [hidden_dim, output_dim]  b2: [output_dim]

    Hidden/output dims are zero-padded to lane multiples (use 256 on v6e/v7x to
    fill the 256x256 MXU when the sizes warrant it) so every kernel tile is
    lane-dense.  The contraction dim K is NOT padded: x is consumed with a
    full-extent feature block, so x never needs a per-call feature pad/cast.
    """
    K, H = w1.shape
    O = w2.shape[1]
    Hp = _round_up(H, lane_multiple)
    Op = _round_up(O, lane_multiple)

    w1p = jnp.zeros((K, Hp), compute_dtype).at[:, :H].set(w1.astype(compute_dtype))
    b1p = jnp.zeros((1, Hp), jnp.float32).at[:, :H].set(
        jnp.reshape(b1, (1, H)).astype(jnp.float32))
    w2p = jnp.zeros((Hp, Op), compute_dtype).at[:H, :O].set(w2.astype(compute_dtype))
    b2p = jnp.zeros((1, Op), jnp.float32).at[:, :O].set(
        jnp.reshape(b2, (1, O)).astype(jnp.float32))
    return w1p, b1p, w2p, b2p


def mlp_forward(x, w1p, b1p, w2p, b2p, *, out_dim=None,
                tile_batch=128, tile_hidden=512):
    """Eval-mode MLP forward using pre-padded/pre-cast params from prepare_params.

    x: [B, input_dim] (any float dtype; output matches x.dtype).
    """
    B, K = x.shape
    Kw, Hp = w1p.shape
    Op = w2p.shape[1]
    assert K == Kw, "x feature dim must match w1"
    O = Op if out_dim is None else out_dim

    tb = _pick_batch_tile(B, tile_batch)
    th = _pick_hidden_tile(Hp, tile_hidden)
    Bp = _round_up(B, tb)

    # Only the batch dim may need padding; skip the copy entirely when aligned.
    xp = x if Bp == B else jnp.zeros((Bp, K), x.dtype).at[:B].set(x)

    out_dtype = x.dtype
    out_isize = jnp.dtype(out_dtype).itemsize
    grid = (Bp // tb, Hp // th)

    flops = 2 * Bp * (K * Hp + Hp * Op)
    bytes_accessed = (xp.size * xp.dtype.itemsize
                      + w1p.size * w1p.dtype.itemsize + b1p.size * 4
                      + w2p.size * w2p.dtype.itemsize + b2p.size * 4
                      + Bp * Op * out_isize)

    # Size the scoped VMEM limit to the actual resident buffers (double-buffered
    # inputs/outputs + accumulator + intermediate), capped at 64 MiB so it is
    # valid on every generation (v7x physical VMEM is 64 MiB).
    cdt = jnp.dtype(w1p.dtype).itemsize
    vmem_bytes = (2 * tb * K * x.dtype.itemsize     # x blocks
                  + 2 * K * th * cdt                # W1 slabs
                  + 2 * th * 4                      # b1 slabs
                  + 2 * th * Op * cdt               # W2 slabs
                  + 2 * Op * 4                      # b2
                  + 2 * tb * Op * out_isize         # out blocks
                  + tb * Op * 4                     # accumulator scratch
                  + tb * th * 4)                    # intermediate h
    vmem_limit = int(min(64 * 2**20, max(32 * 2**20, 2 * vmem_bytes)))

    out_padded = pl.pallas_call(
        mlp_kernel,
        out_shape=jax.ShapeDtypeStruct((Bp, Op), out_dtype),
        grid=grid,
        in_specs=[
            pl.BlockSpec((tb, K), lambda i, h: (i, 0)),    # x: full-K block, no pad
            pl.BlockSpec((K, th), lambda i, h: (0, h)),    # W1 hidden slab
            pl.BlockSpec((1, th), lambda i, h: (0, h)),    # b1 hidden slab
            pl.BlockSpec((th, Op), lambda i, h: (h, 0)),   # W2 hidden slab
            pl.BlockSpec((1, Op), lambda i, h: (0, 0)),    # b2 (tiny, grid-invariant)
        ],
        out_specs=pl.BlockSpec((tb, Op), lambda i, h: (i, 0)),
        scratch_shapes=[pltpu.VMEM((tb, Op), jnp.float32)],
        compiler_params=pltpu.CompilerParams(
            dimension_semantics=("parallel", "arbitrary"),
            vmem_limit_bytes=vmem_limit),
        cost_estimate=pl.CostEstimate(
            flops=flops, transcendentals=0, bytes_accessed=bytes_accessed),
    )(xp, w1p, b1p, w2p, b2p)

    if Bp == B and Op == O:
        return out_padded
    return out_padded[:B, :O]


if __name__ == "__main__":
    # Small shapes consistent with the module's forward.
    batch, input_dim, hidden_dim, output_dim = 16, 32, 64, 8

    key = jax.random.PRNGKey(0)
    kx, kw1, kb1, kw2, kb2 = jax.random.split(key, 5)

    x = jax.random.normal(kx, (batch, input_dim), dtype=jnp.float32)

    # Deterministic parameter init (uniform, like nn.Linear's default scale).
    lim1 = 1.0 / (input_dim ** 0.5)
    lim2 = 1.0 / (hidden_dim ** 0.5)
    # Stored pre-transposed relative to PyTorch's [out, in] convention.
    w1 = jax.random.uniform(kw1, (input_dim, hidden_dim), jnp.float32, -lim1, lim1)
    b1 = jax.random.uniform(kb1, (hidden_dim,), jnp.float32, -lim1, lim1)
    w2 = jax.random.uniform(kw2, (hidden_dim, output_dim), jnp.float32, -lim2, lim2)
    b2 = jax.random.uniform(kb2, (output_dim,), jnp.float32, -lim2, lim2)

    # One-time (model-load) pad + bf16 cast of the parameters.
    w1p, b1p, w2p, b2p = jax.block_until_ready(prepare_params(w1, b1, w2, b2))

    fwd = jax.jit(functools.partial(mlp_forward, out_dim=output_dim))
    out = fwd(x, w1p, b1p, w2p, b2p)
    jax.block_until_ready(out)
    assert out.shape == (batch, output_dim)
    assert out.dtype == x.dtype

    # Reference mimicking the kernel's bf16-in / f32-accumulate arithmetic.
    xb = x.astype(jnp.bfloat16).astype(jnp.float32)
    w1b = w1.astype(jnp.bfloat16).astype(jnp.float32)
    w2b = w2.astype(jnp.bfloat16).astype(jnp.float32)
    h_ref = jnp.maximum(xb @ w1b + b1[None, :], 0.0)
    ref_bf16 = h_ref.astype(jnp.bfloat16).astype(jnp.float32) @ w2b + b2[None, :]
    assert jnp.allclose(out, ref_bf16, atol=1e-3, rtol=1e-3)

    # Loose check against the pure-f32 PyTorch-equivalent forward (eval dropout = id).
    ref_f32 = jnp.maximum(x @ w1 + b1[None, :], 0.0) @ w2 + b2[None, :]
    assert jnp.allclose(out, ref_f32, atol=3e-2, rtol=3e-2)

    print("KERNEL_OK")
</pallas_src>

<mosaic_0001>
module attributes {stable_mosaic.version = 11 : i64} {
  func.func @mlp_kernel(%arg0: i32, %arg1: i32, %arg2: memref<8x32xf32, #tpu.memory_space<vmem>>, %arg3: memref<32x128xbf16, #tpu.memory_space<vmem>>, %arg4: memref<1x128xf32, #tpu.memory_space<vmem>>, %arg5: memref<128x128xbf16, #tpu.memory_space<vmem>>, %arg6: memref<1x128xf32, #tpu.memory_space<vmem>>, %arg7: memref<8x128xf32, #tpu.memory_space<vmem>>, %arg8: memref<8x128xf32, #tpu.memory_space<vmem>>) attributes {dimension_semantics = [#tpu.dimension_semantics<parallel>, #tpu.dimension_semantics<arbitrary>], iteration_bounds = array<i64: 2, 1>, scalar_prefetch = 0 : i64, scratch_operands = 1 : i64, tpu.core_type = #tpu.core_type<tc>, window_params = [{transform_indices = @transform_0, window_bounds = array<i64: 8, 32>}, {transform_indices = @transform_1, window_bounds = array<i64: 32, 128>}, {transform_indices = @transform_2, window_bounds = array<i64: 1, 128>}, {transform_indices = @transform_3, window_bounds = array<i64: 128, 128>}, {pipeline_mode = #tpu.pipeline_mode<synchronous>, transform_indices = @transform_4, window_bounds = array<i64: 1, 128>}, {transform_indices = @transform_5, window_bounds = array<i64: 8, 128>}]} {
    %c0_i32 = arith.constant 0 : i32
    %0 = arith.cmpi eq, %arg1, %c0_i32 : i32
    %1 = arith.extui %0 : i1 to i32
    %c0_i32_0 = arith.constant 0 : i32
    %2 = arith.cmpi ne, %1, %c0_i32_0 : i32
    scf.if %2 {
      %cst_16 = arith.constant 0.000000e+00 : f32
      %21 = vector.broadcast %cst_16 : f32 to vector<8x128xf32>
      %c0_17 = arith.constant 0 : index
      %c0_18 = arith.constant 0 : index
      %22 = vector.load %arg8[%c0_17, %c0_18] : memref<8x128xf32, #tpu.memory_space<vmem>>, vector<8x128xf32>
      tpu.vector_store %arg8[%c0_17, %c0_18], %21 {strides = array<i32>} : memref<8x128xf32, #tpu.memory_space<vmem>>, vector<8x128xf32>,
    } else {
    }
    %c0 = arith.constant 0 : index
    %c0_1 = arith.constant 0 : index
    %3 = vector.load %arg2[%c0, %c0_1] : memref<8x32xf32, #tpu.memory_space<vmem>>, vector<8x32xf32>
    %4 = arith.truncf %3 : vector<8x32xf32> to vector<8x32xbf16>
    %c0_2 = arith.constant 0 : index
    %c0_3 = arith.constant 0 : index
    %5 = vector.load %arg3[%c0_2, %c0_3] : memref<32x128xbf16, #tpu.memory_space<vmem>>, vector<32x128xbf16>
    %cst = arith.constant dense<0.000000e+00> : vector<8x128xf32>
    %6 = tpu.matmul %4, %5, %cst {dimension_numbers = #tpu.dot_dimension_numbers<[1], [0], [0], [1], [0, 0, 1, 1], [], []>} : vector<8x32xbf16>, vector<32x128xbf16>, vector<8x128xf32> -> vector<8x128xf32>
    %c0_4 = arith.constant 0 : index
    %c0_5 = arith.constant 0 : index
    %7 = vector.load %arg4[%c0_4, %c0_5] : memref<1x128xf32, #tpu.memory_space<vmem>>, vector<1x128xf32>
    %8 = vector.broadcast %7 : vector<1x128xf32> to vector<8x128xf32>
    %9 = arith.addf %6, %8 : vector<8x128xf32>
    %cst_6 = arith.constant 0.000000e+00 : f32
    %10 = vector.broadcast %cst_6 : f32 to vector<8x128xf32>
    %11 = arith.maximumf %9, %10 : vector<8x128xf32>
    %c0_7 = arith.constant 0 : index
    %c0_8 = arith.constant 0 : index
    %12 = vector.load %arg8[%c0_7, %c0_8] : memref<8x128xf32, #tpu.memory_space<vmem>>, vector<8x128xf32>
    %13 = arith.truncf %11 : vector<8x128xf32> to vector<8x128xbf16>
    %c0_9 = arith.constant 0 : index
    %c0_10 = arith.constant 0 : index
    %14 = vector.load %arg5[%c0_9, %c0_10] : memref<128x128xbf16, #tpu.memory_space<vmem>>, vector<128x128xbf16>
    %cst_11 = arith.constant dense<0.000000e+00> : vector<8x128xf32>
    %15 = tpu.matmul %13, %14, %cst_11 {dimension_numbers = #tpu.dot_dimension_numbers<[1], [0], [0], [1], [0, 0, 1, 1], [], []>} : vector<8x128xbf16>, vector<128x128xbf16>, vector<8x128xf32> -> vector<8x128xf32>
    %16 = arith.addf %12, %15 : vector<8x128xf32>
    %c0_12 = arith.constant 0 : index
    %c0_13 = arith.constant 0 : index
    %17 = vector.load %arg8[%c0_12, %c0_13] : memref<8x128xf32, #tpu.memory_space<vmem>>, vector<8x128xf32>
    tpu.vector_store %arg8[%c0_12, %c0_13], %16 {strides = array<i32>} : memref<8x128xf32, #tpu.memory_space<vmem>>, vector<8x128xf32>,
    %c0_i32_14 = arith.constant 0 : i32
    %18 = arith.cmpi eq, %arg1, %c0_i32_14 : i32
    %19 = arith.extui %18 : i1 to i32
    %c0_i32_15 = arith.constant 0 : i32
    %20 = arith.cmpi ne, %19, %c0_i32_15 : i32
    scf.if %20 {
      %c0_16 = arith.constant 0 : index
      %c0_17 = arith.constant 0 : index
      %21 = vector.load %arg8[%c0_16, %c0_17] : memref<8x128xf32, #tpu.memory_space<vmem>>, vector<8x128xf32>
      %c0_18 = arith.constant 0 : index
      %c0_19 = arith.constant 0 : index
      %22 = vector.load %arg6[%c0_18, %c0_19] : memref<1x128xf32, #tpu.memory_space<vmem>>, vector<1x128xf32>
      %23 = vector.broadcast %22 : vector<1x128xf32> to vector<8x128xf32>
      %24 = arith.addf %21, %23 : vector<8x128xf32>
      %c0_20 = arith.constant 0 : index
      %c0_21 = arith.constant 0 : index
      %25 = vector.load %arg7[%c0_20, %c0_21] : memref<8x128xf32, #tpu.memory_space<vmem>>, vector<8x128xf32>
      tpu.vector_store %arg7[%c0_20, %c0_21], %24 {strides = array<i32>} : memref<8x128xf32, #tpu.memory_space<vmem>>, vector<8x128xf32>,
    } else {
    }
    return
  }
  func.func @transform_0(%arg0: i32, %arg1: i32) -> (i32, i32) {
    %c0_i32 = arith.constant 0 : i32
    %c0_i32_0 = arith.constant 0 : i32
    return %arg0, %c0_i32 : i32, i32
  }
  func.func @transform_1(%arg0: i32, %arg1: i32) -> (i32, i32) {
    %c0_i32 = arith.constant 0 : i32
    %c0_i32_0 = arith.constant 0 : i32
    return %c0_i32, %arg1 : i32, i32
  }
  func.func @transform_2(%arg0: i32, %arg1: i32) -> (i32, i32) {
    %c0_i32 = arith.constant 0 : i32
    %c0_i32_0 = arith.constant 0 : i32
    return %c0_i32, %arg1 : i32, i32
  }
  func.func @transform_3(%arg0: i32, %arg1: i32) -> (i32, i32) {
    %c0_i32 = arith.constant 0 : i32
    %c0_i32_0 = arith.constant 0 : i32
    return %arg1, %c0_i32 : i32, i32
  }
  func.func @transform_4(%arg0: i32, %arg1: i32) -> (i32, i32) {
    %c0_i32 = arith.constant 0 : i32
    %c0_i32_0 = arith.constant 0 : i32
    %c0_i32_1 = arith.constant 0 : i32
    return %c0_i32, %c0_i32_0 : i32, i32
  }
  func.func @transform_5(%arg0: i32, %arg1: i32) -> (i32, i32) {
    %c0_i32 = arith.constant 0 : i32
    %c0_i32_0 = arith.constant 0 : i32
    return %arg0, %c0_i32 : i32, i32
  }
}

</mosaic_0001>

<bundles_post_ra>
// kernel: mlp_forward.1
= control target key start
LH: loop header
LB: loop body
LE: loop exit
PB: predicated region body
PF: predicated region fallthrough
CT: control target
= control target key end

     0   :  { %10 = vsyncpa [#allocation4], 0  ;;  %s1088_s0 = inlined_call_operand.hbm [shape: f32[16,32], index: 0, kind: input, shape index: {}]   ;;  %s1089_s1 = inlined_call_operand.hbm [shape: bf16[32,128], index: 1, kind: input, shape index: {}]   ;;  %s1090_s2 = inlined_call_operand.vmem [shape: f32[1,128], index: 2, kind: input, shape index: {}]   ;;  %s1091_s3 = inlined_call_operand.hbm [shape: bf16[128,128], index: 3, kind: input, shape index: {}]   ;;  %s1092_s4 = inlined_call_operand.vmem [shape: f32[1,128], index: 4, kind: input, shape index: {}]   ;;  %s1093_s5 = inlined_call_operand.vmem [shape: f32[16,128], index: 5, kind: output, shape index: {}]  }
   0x1   :  { %12 = vsyncpa [#allocation4 + $0x1], 0 }
   0x2   :  { %13 = vsyncpa [#allocation6], 0  ;;  %s948_s18 = smov 0   ;;  %s950_s19 = smov 0  }
   0x3   :  { %s952_s20 = smov 0   ;;  %s954_s21 = smov 0  }
   0x4   :  { %s956_s22 = smov 0   ;;  %s958_s23 = smov 0  }
   0x5 LB: > { %s616_s24 = sadd.s32 4294967295, %s909_s23   ;;  %p51_p0 = scmp.ne.s32.totalorder %s893_s19, %s889_s18  ;;  %s909_s23 = sphi %s958_s23, %s19_s23   ;;  %s905_s22 = sphi %s956_s22, %s1106_s22   ;;  %s901_s21 = sphi %s954_s21, %s1105_s21   ;;  %s897_s20 = sphi %s952_s20, %s1104_s20   ;;  %s893_s19 = sphi %s950_s19, %s1103_s19   ;;  %s889_s18 = sphi %s948_s18, %s1102_s18  }
   0x6   : > { %p978_p1 = scmp.eq.s32.totalorder %s616_s24, 0  ;;  %p618_p2 = scmp.ge.s32.totalorder %s909_s23, 1 }
   0x7   : > { %p187_p3 = scmp.lt.s32.totalorder %s909_s23, 3  ;;  %s911_s28 = smov [#allocation5]  }
   0x8   : > { %s1096_s25 = scalar_select %p978_p1, 1, 0 }
   0x9   : > { %p986_p4 = por %p978_p1, %p51_p0  ;;  %p990_p5 = pnand %p618_p2, %p187_p3 }
   0xa   : > { %s201_s29 = sshll.u32 %s911_s28, 4  ;;  %s912_s6 = smov [#allocation7]   ;;  %s202_s29 = int_to_ptr.vmem [resolvable:$true] %s201_s29 }
   0xb   : > { %p695_p6 = pneg %p990_p5  ;;  %s223_s7 = sshll.u32 %s912_s6, 4  ;;  %s224_s7 = int_to_ptr.vmem [resolvable:$true] %s223_s7 }
   0xc   : > { %s786_s8 = scalar_lea.vmem %s202_s29, 256  ;;  %p794_p12 = scmp.lt.s32.totalorder %s202_s29, %s202_s29 }
   0xd   : > { %p998_p7 = pnand %p695_p6, %p978_p1  ;;  %p787_p9 = scmp.ne.s32.totalorder %s202_s29, %s786_s8 }
   0xe   : > { %p795_p13 = scmp.lt.s32.totalorder %s786_s8, %s786_s8 }
   0xf   : > { %p777_p8 = pneg %p998_p7 }
  0x10   : > { %p796_p0 = por %p795_p13, %p794_p12 }
  0x11   : > { %p789_p10 = pnand %p787_p9, %p777_p8 }
  0x13   : > { %p790_p11 = pneg %p789_p10 }
  0x15   : > { %p797_p2 = pnand %p796_p0, %p790_p11 }
  0x17   : > { %800 = shalt.err (!%p797_p2)
}
  0x18   : > { %s913_s9 = smov 64   ;;  %s914_s10 = smov 4  }
  0x19   : > { %698 = dma.hbm_to_vmem [thread:$0]  (!%p998_p7), %s1089_s1, 256, %s202_s29, [#allocation6], %s913_s9, %s913_s9, %s914_s10  }
  0x1a   : > { %s812_s13 = scalar_lea.vmem %s224_s7, 1024  ;;  %p820_p10 = scmp.lt.s32.totalorder %s224_s7, %s224_s7 }
  0x1b   : > { %p813_p3 = scmp.ne.s32.totalorder %s224_s7, %s812_s13  ;;  %p821_p1 = scmp.lt.s32.totalorder %s812_s13, %s812_s13 }
  0x1d   : > { %p815_p6 = pnand %p813_p3, %p777_p8  ;;  %p822_p12 = por %p821_p1, %p820_p10 }
  0x1f   : > { %p816_p9 = pneg %p815_p6 }
  0x21   : > { %p823_p11 = pnand %p822_p12, %p816_p9 }
  0x23   : > { %826 = shalt.err (!%p823_p11)
}
  0x24   : > { %701 = dma.hbm_to_vmem [thread:$0]  (!%p998_p7), %s1091_s3, 1024, %s224_s7, [#allocation6], %s913_s9, %s913_s9, %s914_s10  }
  0x25   : > { %s31_s16 = sadd.s32 1, %s905_s22  ;;  %s38_s17 = sadd.s32 1, %s897_s20 }
  0x26   : > { %p33_p1 = scmp.ge.s32.totalorder %s31_s16, 2  ;;  %p45_p8 = scmp.ne.s32.totalorder %s897_s20, %s893_s19 }
  0x27   : > { %p46_p13 = scmp.eq.s32.totalorder %s909_s23, 0  ;;  %p708_p0 = scmp.lt.s32.totalorder %s909_s23, 2 }
  0x28   : > { %s1108_s16 = smov (%p33_p1, %s31_s16), 0  ;;  %s240_s18 = sand.u32 1, %s897_s20  }
  0x29   : > { %p47_p2 = por %p46_p13, %p45_p8  ;;  %s35_s24 = ssub.s32 %s905_s22, %s1108_s16 }
  0x2a   : > { %p36_p3 = scmp.eq.s32.totalorder %s35_s24, 0  ;;  %s623_s28 = sshll.u32 %s240_s18, 3 }
  0x2b   : > { %s624_s29 = sshll.u32 %s905_s22, 7  ;;  %s244_s9 = scalar_lea.vmem [#allocation3], %s623_s28 }
  0x2c   : > { %s1033_s30 = scalar_select %p36_p3, %s897_s20, %s38_s17  }
  0x2d   : > { %s249_s8 = scalar_lea.hbm %s1088_s0, %s624_s29  ;;  %s251_s10 = sshll.u32 %s244_s9, 4  ;;  %s252_s10 = int_to_ptr.vmem [resolvable:$true] %s251_s10 }
  0x2e   : > { %p1040_p7 = pnand %p708_p0, %p47_p2  ;;  %s241_s12 = scalar_lea.sflag [#allocation4], %s240_s18 }
  0x2f   : > { %s840_s13 = scalar_lea.vmem %s252_s10, 128  ;;  %s915_s14 = smov [#allocation3]  }
  0x30   : > { %p829_p6 = pneg %p1040_p7  ;;  %p841_p9 = scmp.ne.s32.totalorder %s252_s10, %s840_s13 }
  0x31   : > { %s845_s15 = sshll.u32 %s915_s14, 4  ;;  %s846_s15 = int_to_ptr.vmem [resolvable:$false] %s845_s15 }
  0x32   : > { %p843_p10 = pnand %p841_p9, %p829_p6  ;;  %s847_s17 = scalar_lea.vmem %s846_s15, 256 }
  0x33   : > { %p848_p11 = scmp.lt.s32.totalorder %s252_s10, %s846_s15  ;;  %p849_p1 = scmp.lt.s32.totalorder %s847_s17, %s840_s13 }
  0x34   : > { %p844_p12 = pneg %p843_p10 }
  0x35   : > { %p850_p8 = por %p849_p1, %p848_p11 }
  0x37   : > { %p851_p13 = pnand %p850_p8, %p844_p12 }
  0x39   : > { %854 = shalt.err (!%p851_p13)
}
  0x3a   : > { %705 = dma.hbm_to_vmem [thread:$0]  (!%p1040_p7), %s249_s8, 128, %s252_s10, %s241_s12  }
  0x3b   : > { %260 = sbr.rel (%p990_p5) target bundleno = 476 (0x1dc), region = 40  ;;  %s262_s18 = sand.u32 (!%p990_p5), 1, %s893_s19  }
  0x3c   : > { %s626_s24 = sshll.u32 (!%p990_p5), %s262_s18, 3  ;;  %s263_s28 = scalar_lea.sflag (!%p990_p5), [#allocation4], %s262_s18 }
  0x3d   : > { %s266_s29 = scalar_lea.vmem (!%p990_p5), [#allocation3], %s626_s24 }
  0x40   : > { %880 = dma.done.wait (%p986_p4), %s263_s28, 128  }
  0x41   : > { %882 = vsyncadd (%p986_p4), %s263_s28, 4294967168  ;;  %p1101_p0 = scmp.ne.s32.totalorder %s1096_s25, 0 }
  0x43   : > { %884 = dma.done.wait (%p1101_p0), [#allocation6], 1280  }
  0x44   : > { %886 = vsyncadd (%p1101_p0), [#allocation6], 4294966016  ;;  %v916_v0 = vmov 0.0   ;;  %vm917_vm0 = vmmov 0   ;;  %v765_v1 = vld [vmem:[#allocation5 + $0x8] sm:$0xff]   ;;  %v766_v2 = vld [vmem:[#allocation5] sm:$0xff]  }
  0x45   : > { %657 = vmatprep.subr.bf16.mxu0 %v916_v0  ;;  %661 = vmatprep.mubr.msk.bf16.mxu0 %vm917_vm0, %v916_v0  ;;  %v317_v3 = vld [vmem:[%s266_s29] sm:$0xff]  ;;  %v767_v4 = vld [vmem:[#allocation7 + $0x38] sm:$0xff]   ;;  %v768_v6 = vld [vmem:[#allocation7 + $0x30] sm:$0xff]   ;;  %vm342_vm1 = vcmask 261120   ;;  %p307_p4 = scmp.lt.s32.totalorder %s901_s21, 1 }
  0x46   : > { %665 = vmatprep.subr.bf16.mxu1 %v916_v0  ;;  %681 = vmatprep.mubr.msk.bf16.mxu1 %vm917_vm0, %v916_v0  ;;  %v318_v5 = vpack.c.bf16 %v317_v3, %v317_v3  ;;  %v769_v7 = vld [vmem:[#allocation7 + $0x28] sm:$0xff]   ;;  %v770_v8 = vld [vmem:[#allocation7 + $0x20] sm:$0xff]   ;;  %v771_v9 = vld [vmem:[#allocation7 + $0x18] sm:$0xff]  }
  0x47   : > { %658 = vmatpush3.bf16.msra.mxu0 %v765_v1  ;;  %666 = vmatpush3.bf16.msra.mxu1 %v767_v4  ;;  %v772_v10 = vld [vmem:[#allocation7 + $0x10] sm:$0xff]   ;;  %v773_v11 = vld [vmem:[#allocation7 + $0x8] sm:$0xff]   ;;  %v774_v12 = vld [vmem:[#allocation7] sm:$0xff]   ;;  %s1110_s21 = smov (!%p307_p4, %s901_s21), 1 }
  0x48   : > { %659 = vmatprep.subr.bf16.mxu0 %v916_v0  ;;  %667 = vmatprep.subr.bf16.mxu1 %v916_v0  ;;  %v630_v13 = vld [vmem:[%s1090_s2] ss:$0 sm:$0xff]  ;;  %s629_s27 = sshll.u32 %s1110_s21, 3 }
  0x49   : > { %v642_v21 = vld [vmem:[%s1092_s4] ss:$0 sm:$0xff]  ;;  %s310_s10 = scalar_lea.vmem %s1093_s5, %s629_s27 }
  0x4b   : > { %660 = vmatpush3.bf16.msra.mxu0 %v766_v2  ;;  %668 = vmatpush3.bf16.msra.mxu1 %v768_v6 }
  0x4c   : > { %669 = vmatprep.subr.bf16.mxu1 %v916_v0 }
  0x4e   : > { %662 = vmatmul.mubr.msk.bf16.vlgmr.msra.gmra.mxu0 %vm342_vm1, %v318_v5 }
  0x4f   : > { %670 = vmatpush3.bf16.msra.mxu1 %v769_v7 }
  0x50   : > { %671 = vmatprep.subr.bf16.mxu1 %v916_v0 }
  0x53   : > { %672 = vmatpush3.bf16.msra.mxu1 %v770_v8 }
  0x54   : > { %673 = vmatprep.subr.bf16.mxu1 %v916_v0 }
  0x57   : > { %674 = vmatpush3.bf16.msra.mxu1 %v771_v9 }
  0x58   : > { %675 = vmatprep.subr.bf16.mxu1 %v916_v0 }
  0x5b   : > { %676 = vmatpush3.bf16.msra.mxu1 %v772_v10 }
  0x5c   : > { %677 = vmatprep.subr.bf16.mxu1 %v916_v0 }
  0x5f   : > { %678 = vmatpush3.bf16.msra.mxu1 %v773_v11 }
  0x60   : > { %679 = vmatprep.subr.bf16.mxu1 %v916_v0 }
  0x63   : > { %680 = vmatpush3.bf16.msra.mxu1 %v774_v12 }
 0x10e   : > { %v380_v14 = vpop.f32.mrf.mxu0 }
 0x10f   : > { %v381_v15 = vadd.f32 %v630_v13, %v380_v14 }
 0x110   : > { %v663_v16 = vpop.f32.mrf.mxu0 }
 0x111   : > { %v386_v17 = vmax.f32 %v381_v15, 0.0 }
 0x112   : > { %v383_v18 = vpop.f32.mrf.mxu0 }
 0x113   : > { %v388_v19 = vpack.c.bf16 %v386_v17, %v386_v17 }
 0x114   : > { %v664_v20 = vpop.f32.mrf.mxu0 }
 0x115   : > { %682 = vmatmul.mubr.bf16.vlgmr.msra.gmra.mxu1 %v388_v19 }
 0x1d5   : > { %v487_v22 = vpop.f32.mrf.mxu1 }
 0x1d6   : > { %v506_v23 = vadd.f32 %v642_v21, %v487_v22 }
 0x1d7   : > { %v683_v24 = vpop.f32.mrf.mxu1 }
 0x1d8   : > { %507 = vst [vmem:[%s310_s10] sm:$0xff] %v506_v23 }
 0x1d9   : > { %v490_v25 = vpop.f32.mrf.mxu1 }
 0x1db   : > { %v684_v26 = vpop.f32.mrf.mxu1 }
 0x1dc PF: > { %s19_s23 = sadd.s32 1, %s909_s23   ;;  %s1102_s18 = smov %s893_s19 }
 0x1dd   : > { %p16_p5 = scmp.ge.s32.totalorder %s19_s23, 4   ;;  %s1103_s19 = smov %s897_s20 }
 0x1de   : > { %s1104_s20 = smov %s1033_s30  ;;  %s1105_s21 = smov %s905_s22 }
 0x1df   : > { %s1106_s22 = smov %s1108_s16  ;;  %18 = sbr.rel (!%p16_p5) target bundleno = 5 (0x5), region = 101 }
 0x1e4   :  { %527 = vsyncpa [#allocation4], 1 }
 0x1e5   :  { %529 = vsyncpa [#allocation4 + $0x1], 1 }
 0x1e6   :  { %530 = vsyncpa [#allocation6], 1 }

</bundles_post_ra>
